<compile_context>
chip_gen: v5e
topology: v5e:2x2
jax: 0.10.0
libtpu: 0.0.40
codegen_flags: <defaults>
</compile_context>

<pallas_src>
import jax
import jax.numpy as jnp
from jax.experimental import pallas as pl
from jax.experimental.pallas import tpu as pltpu


def _attention_kernel(h_ref, att_ref, patt_ref,
                      wh_ref, bh_ref, wa_ref, ba_ref,
                      out_ref):
    f32 = jnp.float32

    # h2att on the MXU: (TB, R) @ (R, H) + (1, H) -> (TB, H)
    att_h = jnp.dot(h_ref[...].astype(f32), wh_ref[...],
                    preferred_element_type=f32) + bh_ref[...]

    # dot = tanh(p_att_feats + att_h) : (TB, A, H).  Streamed inputs may be bf16;
    # upcast before tanh/exp (v5e VPU/EUP have no bf16 arithmetic).
    dot = jnp.tanh(patt_ref[...].astype(f32) + att_h[:, None, :])

    # alpha_net: reduce over H (lane axis) -> lane-dense (TB, A) scores.
    # Kept on VPU+XLU: an MXU matvec (K=H, N=1) yields a lane-1 column and would
    # force a sublane->lane relayout before the lane-dense softmax below.
    scores = jnp.sum(dot * wa_ref[...], axis=-1) + ba_ref[...]          # (TB, A)

    # Numerically-stable softmax over att positions (lane axis), exact reciprocal.
    m = jnp.max(scores, axis=-1, keepdims=True)                         # (TB, 1)
    e = jnp.exp(scores - m)                                             # (TB, A)
    w = e * pl.reciprocal(jnp.sum(e, axis=-1, keepdims=True))           # exact

    # Weighted sum over A: (TB, A, 1) * (TB, A, R) -> sum over A -> (TB, R).
    # Kept on VPU/XLU: the MXU alternative is a batched M=1 dot_general whose
    # per-batch weight push (K=A, N=R) is never amortized and exceeds the VPU cost.
    out_ref[...] = jnp.sum(
        w[:, :, None] * att_ref[...].astype(f32), axis=1).astype(out_ref.dtype)


def _physical_vmem_bytes():
    # Trace-time hardware query; conservative fallback = v7x per-TC VMEM (64 MiB).
    try:
        return int(pltpu.get_tpu_info().vmem_capacity_bytes)
    except Exception:
        return 64 * 1024 * 1024


def attention_forward(h, att_feats, p_att_feats, wh, bh, wa, ba,
                      *, tb=None, buffers=2):
    B, R = h.shape
    _, A, _ = att_feats.shape
    H = wh.shape[1]

    phys = _physical_vmem_bytes()
    # Per-generation scoped-VMEM limit: ~48 MiB on v7x, ~100 MiB on v5e/v6e.
    vmem_limit = max(32 * 1024 * 1024, min(100 * 1024 * 1024, phys - 16 * 1024 * 1024))

    if tb is None:
        # Budget the batch tile against physical VMEM: two streamed blocks
        # (double/`buffers`-buffered) in their storage dtype + ~2 f32 temporaries
        # of the p_att block shape inside the body, plus resident weights.
        in_bytes = max(att_feats.dtype.itemsize, p_att_feats.dtype.itemsize)
        per_row = buffers * A * (R + H) * in_bytes + 2 * A * H * 4
        weights = (R + 2) * H * 4
        budget = int(phys * 0.7) - weights
        tb = max(8, min(128, (budget // max(per_row, 1)) // 8 * 8))
        tb = min(tb, max(8, ((B + 7) // 8) * 8))   # don't tile more than needed

    n_tiles = pl.cdiv(B, tb)
    # Keep both v7x TensorCores busy on the last step of the parallel batch axis.
    if n_tiles > 1 and n_tiles % 2 == 1:
        n_tiles += 1
    Bp = n_tiles * tb

    # Zero-pad the batch: padded rows are mathematically benign (zero feats ->
    # zero contribution, finite softmax) and are sliced off afterwards.
    if Bp != B:
        pad = Bp - B
        h = jnp.pad(h, ((0, pad), (0, 0)))
        att_feats = jnp.pad(att_feats, ((0, pad), (0, 0), (0, 0)))
        p_att_feats = jnp.pad(p_att_feats, ((0, pad), (0, 0), (0, 0)))

    stream_kwargs = {}
    if buffers != 2:  # deeper prefetch if profiling shows exposed DMA
        stream_kwargs = dict(pipeline_mode=pl.Buffered(buffers))

    out = pl.pallas_call(
        _attention_kernel,
        out_shape=jax.ShapeDtypeStruct((Bp, R), jnp.float32),
        grid_spec=pltpu.PrefetchScalarGridSpec(
            num_scalar_prefetch=0,
            grid=(n_tiles,),
            in_specs=[
                pl.BlockSpec((tb, R), lambda b: (b, 0)),                        # h
                pl.BlockSpec((tb, A, R), lambda b: (b, 0, 0), **stream_kwargs),  # att_feats
                pl.BlockSpec((tb, A, H), lambda b: (b, 0, 0), **stream_kwargs),  # p_att_feats
                pl.BlockSpec((R, H), lambda b: (0, 0)),                         # W_h2att (VMEM-resident)
                pl.BlockSpec((1, H), lambda b: (0, 0)),                         # b_h2att
                pl.BlockSpec((1, H), lambda b: (0, 0)),                         # w_alpha
                pl.BlockSpec((1, 1), lambda b: (0, 0)),                         # b_alpha
            ],
            out_specs=pl.BlockSpec((tb, R), lambda b: (b, 0)),
        ),
        compiler_params=pltpu.CompilerParams(
            dimension_semantics=("parallel",),
            vmem_limit_bytes=vmem_limit,
        ),
    )(h, att_feats, p_att_feats, wh, bh, wa, ba)

    return out[:B]


def attention_reference(h, att_feats, p_att_feats, wh, bh, wa, ba):
    # Pure-JAX f32 reference mirroring the PyTorch forward.
    f32 = jnp.float32
    att_h = h.astype(f32) @ wh + bh                                   # (B, H)
    dot = jnp.tanh(p_att_feats.astype(f32) + att_h[:, None, :])       # (B, A, H)
    scores = jnp.einsum("bah,h->ba", dot, wa[0]) + ba[0, 0]
    weight = jax.nn.softmax(scores, axis=1)                           # (B, A)
    return jnp.einsum("ba,bar->br", weight, att_feats.astype(f32))


if __name__ == "__main__":
    # Small, module-consistent shapes.  B is deliberately not a multiple of the
    # batch tile (tb=8) so both the ragged-padding and the even-n_tiles paths are
    # exercised (B=20, tb=8 -> 3 tiles -> padded to 4).  NOTE: tune with
    # production shapes (R≈H≈512, A≈196, large B) before drawing perf conclusions.
    B = 20           # batch
    A = 16           # att_size (number of attention locations)
    rnn_size = 32
    att_hid = 32

    key = jax.random.PRNGKey(0)
    k1, k2, k3, k4, k5, k6, k7 = jax.random.split(key, 7)

    h = jax.random.normal(k1, (B, rnn_size), dtype=jnp.float32)
    att_feats = jax.random.normal(k2, (B, A, rnn_size), dtype=jnp.float32)
    p_att_feats = jax.random.normal(k3, (B, A, att_hid), dtype=jnp.float32)

    # Deterministic synthetic parameters (no checkpoint load).
    wh = 0.1 * jax.random.normal(k4, (rnn_size, att_hid), dtype=jnp.float32)
    bh = 0.1 * jax.random.normal(k5, (1, att_hid), dtype=jnp.float32)
    wa = 0.1 * jax.random.normal(k6, (1, att_hid), dtype=jnp.float32)
    ba = 0.1 * jax.random.normal(k7, (1, 1), dtype=jnp.float32)

    ref = attention_reference(h, att_feats, p_att_feats, wh, bh, wa, ba)

    # f32 path — exact softmax reciprocal, tight tolerance.
    out = attention_forward(h, att_feats, p_att_feats, wh, bh, wa, ba, tb=8)
    out = jax.block_until_ready(out)
    assert out.shape == (B, rnn_size)
    assert jnp.allclose(out, ref, atol=1e-4, rtol=1e-4), "f32 mismatch vs reference"

    # bf16-streaming path (halves HBM traffic for the two large inputs; kernel
    # upcasts to f32 after load).  Looser tolerance is from bf16 input rounding.
    out_bf16 = attention_forward(
        h, att_feats.astype(jnp.bfloat16), p_att_feats.astype(jnp.bfloat16),
        wh, bh, wa, ba, tb=8)
    out_bf16 = jax.block_until_ready(out_bf16)
    assert jnp.allclose(out_bf16, ref, atol=0.1, rtol=0.1), "bf16 mismatch vs reference"

    print("KERNEL_OK")
</pallas_src>

<mosaic_0001>
module attributes {stable_mosaic.version = 11 : i64} {
  func.func @_attention_kernel(%arg0: i32, %arg1: memref<8x32xf32, #tpu.memory_space<vmem>>, %arg2: memref<8x16x32xf32, #tpu.memory_space<vmem>>, %arg3: memref<8x16x32xf32, #tpu.memory_space<vmem>>, %arg4: memref<32x32xf32, #tpu.memory_space<vmem>>, %arg5: memref<1x32xf32, #tpu.memory_space<vmem>>, %arg6: memref<1x32xf32, #tpu.memory_space<vmem>>, %arg7: memref<1x1xf32, #tpu.memory_space<vmem>>, %arg8: memref<8x32xf32, #tpu.memory_space<vmem>>) attributes {dimension_semantics = [#tpu.dimension_semantics<parallel>], iteration_bounds = array<i64: 4>, scalar_prefetch = 0 : i64, scratch_operands = 0 : i64, tpu.core_type = #tpu.core_type<tc>, window_params = [{transform_indices = @transform_0, window_bounds = array<i64: 8, 32>}, {transform_indices = @transform_1, window_bounds = array<i64: 8, 16, 32>}, {transform_indices = @transform_2, window_bounds = array<i64: 8, 16, 32>}, {pipeline_mode = #tpu.pipeline_mode<synchronous>, transform_indices = @transform_3, window_bounds = array<i64: 32, 32>}, {pipeline_mode = #tpu.pipeline_mode<synchronous>, transform_indices = @transform_4, window_bounds = array<i64: 1, 32>}, {pipeline_mode = #tpu.pipeline_mode<synchronous>, transform_indices = @transform_5, window_bounds = array<i64: 1, 32>}, {pipeline_mode = #tpu.pipeline_mode<synchronous>, transform_indices = @transform_6, window_bounds = array<i64: 1, 1>}, {transform_indices = @transform_7, window_bounds = array<i64: 8, 32>}]} {
    %c0 = arith.constant 0 : index
    %c0_0 = arith.constant 0 : index
    %0 = vector.load %arg1[%c0, %c0_0] : memref<8x32xf32, #tpu.memory_space<vmem>>, vector<8x32xf32>
    %c0_1 = arith.constant 0 : index
    %c0_2 = arith.constant 0 : index
    %1 = vector.load %arg4[%c0_1, %c0_2] : memref<32x32xf32, #tpu.memory_space<vmem>>, vector<32x32xf32>
    %cst = arith.constant dense<0.000000e+00> : vector<8x32xf32>
    %2 = tpu.matmul %0, %1, %cst {dimension_numbers = #tpu.dot_dimension_numbers<[1], [0], [0], [1], [0, 0, 1, 1], [], []>} : vector<8x32xf32>, vector<32x32xf32>, vector<8x32xf32> -> vector<8x32xf32>
    %c0_3 = arith.constant 0 : index
    %c0_4 = arith.constant 0 : index
    %3 = vector.load %arg5[%c0_3, %c0_4] : memref<1x32xf32, #tpu.memory_space<vmem>>, vector<1x32xf32>
    %4 = vector.broadcast %3 : vector<1x32xf32> to vector<8x32xf32>
    %5 = arith.addf %2, %4 : vector<8x32xf32>
    %c0_5 = arith.constant 0 : index
    %c0_6 = arith.constant 0 : index
    %c0_7 = arith.constant 0 : index
    %6 = vector.load %arg3[%c0_5, %c0_6, %c0_7] : memref<8x16x32xf32, #tpu.memory_space<vmem>>, vector<8x16x32xf32>
    %7 = vector.shape_cast %5 : vector<8x32xf32> to vector<8x1x32xf32>
    %8 = vector.broadcast %7 : vector<8x1x32xf32> to vector<8x16x32xf32>
    %9 = arith.addf %6, %8 : vector<8x16x32xf32>
    %10 = math.tanh %9 : vector<8x16x32xf32>
    %c0_8 = arith.constant 0 : index
    %c0_9 = arith.constant 0 : index
    %11 = vector.load %arg6[%c0_8, %c0_9] : memref<1x32xf32, #tpu.memory_space<vmem>>, vector<1x32xf32>
    %12 = vector.shape_cast %11 : vector<1x32xf32> to vector<1x1x32xf32>
    %13 = vector.broadcast %12 : vector<1x1x32xf32> to vector<8x16x32xf32>
    %14 = arith.mulf %10, %13 : vector<8x16x32xf32>
    %cst_10 = arith.constant dense<0.000000e+00> : vector<8x16xf32>
    %15 = vector.multi_reduction <add>, %14, %cst_10 [2] : vector<8x16x32xf32> to vector<8x16xf32>
    %c0_11 = arith.constant 0 : index
    %c0_12 = arith.constant 0 : index
    %16 = vector.load %arg7[%c0_11, %c0_12] : memref<1x1xf32, #tpu.memory_space<vmem>>, vector<1x1xf32>
    %17 = vector.broadcast %16 : vector<1x1xf32> to vector<8x16xf32>
    %18 = arith.addf %15, %17 : vector<8x16xf32>
    %cst_13 = arith.constant dense<0xFF800000> : vector<8xf32>
    %19 = vector.multi_reduction <maximumf>, %18, %cst_13 [1] : vector<8x16xf32> to vector<8xf32>
    %20 = vector.shape_cast %19 : vector<8xf32> to vector<8x1xf32>
    %21 = vector.broadcast %20 : vector<8x1xf32> to vector<8x16xf32>
    %22 = arith.subf %18, %21 : vector<8x16xf32>
    %23 = math.exp %22 : vector<8x16xf32>
    %cst_14 = arith.constant dense<0.000000e+00> : vector<8xf32>
    %24 = vector.multi_reduction <add>, %23, %cst_14 [1] : vector<8x16xf32> to vector<8xf32>
    %25 = vector.shape_cast %24 : vector<8xf32> to vector<8x1xf32>
    %26 = tpu.reciprocal %25 : vector<8x1xf32> -> vector<8x1xf32>
    %27 = vector.broadcast %26 : vector<8x1xf32> to vector<8x16xf32>
    %28 = arith.mulf %23, %27 : vector<8x16xf32>
    %29 = vector.shape_cast %28 : vector<8x16xf32> to vector<8x16x1xf32>
    %c0_15 = arith.constant 0 : index
    %c0_16 = arith.constant 0 : index
    %c0_17 = arith.constant 0 : index
    %30 = vector.load %arg2[%c0_15, %c0_16, %c0_17] : memref<8x16x32xf32, #tpu.memory_space<vmem>>, vector<8x16x32xf32>
    %31 = vector.broadcast %29 : vector<8x16x1xf32> to vector<8x16x32xf32>
    %32 = arith.mulf %31, %30 : vector<8x16x32xf32>
    %cst_18 = arith.constant dense<0.000000e+00> : vector<8x32xf32>
    %33 = vector.multi_reduction <add>, %32, %cst_18 [1] : vector<8x16x32xf32> to vector<8x32xf32>
    %c0_19 = arith.constant 0 : index
    %c0_20 = arith.constant 0 : index
    %34 = vector.load %arg8[%c0_19, %c0_20] : memref<8x32xf32, #tpu.memory_space<vmem>>, vector<8x32xf32>
    tpu.vector_store %arg8[%c0_19, %c0_20], %33 {strides = array<i32>} : memref<8x32xf32, #tpu.memory_space<vmem>>, vector<8x32xf32>,
    return
  }
  func.func @transform_0(%arg0: i32) -> (i32, i32) {
    %c0_i32 = arith.constant 0 : i32
    %c0_i32_0 = arith.constant 0 : i32
    return %arg0, %c0_i32 : i32, i32
  }
  func.func @transform_1(%arg0: i32) -> (i32, i32, i32) {
    %c0_i32 = arith.constant 0 : i32
    %c0_i32_0 = arith.constant 0 : i32
    %c0_i32_1 = arith.constant 0 : i32
    return %arg0, %c0_i32, %c0_i32_0 : i32, i32, i32
  }
  func.func @transform_2(%arg0: i32) -> (i32, i32, i32) {
    %c0_i32 = arith.constant 0 : i32
    %c0_i32_0 = arith.constant 0 : i32
    %c0_i32_1 = arith.constant 0 : i32
    return %arg0, %c0_i32, %c0_i32_0 : i32, i32, i32
  }
  func.func @transform_3(%arg0: i32) -> (i32, i32) {
    %c0_i32 = arith.constant 0 : i32
    %c0_i32_0 = arith.constant 0 : i32
    %c0_i32_1 = arith.constant 0 : i32
    return %c0_i32, %c0_i32_0 : i32, i32
  }
  func.func @transform_4(%arg0: i32) -> (i32, i32) {
    %c0_i32 = arith.constant 0 : i32
    %c0_i32_0 = arith.constant 0 : i32
    %c0_i32_1 = arith.constant 0 : i32
    return %c0_i32, %c0_i32_0 : i32, i32
  }
  func.func @transform_5(%arg0: i32) -> (i32, i32) {
    %c0_i32 = arith.constant 0 : i32
    %c0_i32_0 = arith.constant 0 : i32
    %c0_i32_1 = arith.constant 0 : i32
    return %c0_i32, %c0_i32_0 : i32, i32
  }
  func.func @transform_6(%arg0: i32) -> (i32, i32) {
    %c0_i32 = arith.constant 0 : i32
    %c0_i32_0 = arith.constant 0 : i32
    %c0_i32_1 = arith.constant 0 : i32
    return %c0_i32, %c0_i32_0 : i32, i32
  }
  func.func @transform_7(%arg0: i32) -> (i32, i32) {
    %c0_i32 = arith.constant 0 : i32
    %c0_i32_0 = arith.constant 0 : i32
    return %arg0, %c0_i32 : i32, i32
  }
}

</mosaic_0001>

<bundles_post_ra>
// kernel: tpu_custom_call.1
= control target key start
LH: loop header
LB: loop body
LE: loop exit
PB: predicated region body
PF: predicated region fallthrough
CT: control target
= control target key end

     0   :  { %s2146_s0 = inlined_call_operand.hbm [shape: f32[32,32], index: 0, kind: input, shape index: {}]   ;;  %s2147_s1 = inlined_call_operand.hbm [shape: f32[32,16,32], index: 1, kind: input, shape index: {}]   ;;  %s2148_s2 = inlined_call_operand.hbm [shape: f32[32,16,32], index: 2, kind: input, shape index: {}]   ;;  %s2149_s3 = inlined_call_operand.hbm [shape: f32[32,32], index: 3, kind: input, shape index: {}]   ;;  %s2150_s4 = inlined_call_operand.vmem [shape: f32[1,32], index: 4, kind: input, shape index: {}]   ;;  %s2151_s5 = inlined_call_operand.vmem [shape: f32[1,32], index: 5, kind: input, shape index: {}]   ;;  %s2152_s6 = inlined_call_operand.<no memory space> [shape: f32[1,1], index: 6, kind: input, shape index: {}]   ;;  %s2153_s7 = inlined_call_operand.hbm [shape: f32[32,32], index: 7, kind: output, shape index: {}]  }
   0x1   :  { %2164 = sst [smem:[#allocation21_spill]] %s2147_s1  ;;  %v12_v0 = vstv %s2152_s6 }
   0x2   :  { %2165 = sst [smem:[#allocation22_spill]] %s2149_s3  ;;  %13 = vst [vmem:[#allocation2] sm:$0x1] %v12_v0 }
   0x3   :  { %14 = vsyncpa [#allocation4], 0 }
   0x4   :  { %16 = vsyncpa [#allocation4 + $0x1], 0 }
   0x5   :  { %17 = vsyncpa [#allocation7], 0 }
   0x6   :  { %19 = vsyncpa [#allocation7 + $0x1], 0 }
   0x7   :  { %20 = vsyncpa [#allocation10], 0 }
   0x8   :  { %21 = vsyncpa [#allocation5], 0 }
   0x9   :  { %23 = vsyncpa [#allocation5 + $0x1], 0  ;;  %s1624_s26 = smov 0   ;;  %s1626_s27 = smov 0  }
   0xa   :  { %s1628_s28 = smov 0   ;;  %s1630_s29 = smov 0  }
   0xb LB: > { %2166 = sst [smem:[#allocation16_spill]] %s1563_s26  ;;  %s1645_s6 = sadd.s32 1, %s1575_s29   ;;  %s1575_s29 = sphi %s1630_s29, %s2184_s29   ;;  %s1571_s28 = sphi %s1628_s28, %s2186_s28   ;;  %s1567_s27 = sphi %s1626_s27, %s2188_s27   ;;  %s1563_s26 = sphi %s1624_s26, %s2187_s26  }
   0xc   : > { %2167 = sst [smem:[#allocation17_spill]] %s1571_s28  ;;  %s36_s30 = sadd.s32 1, %s1571_s28 }
   0xd   : > { %2168 = sst [smem:[#allocation18_spill]] %s1645_s6  ;;  %s33_s8 = ssub.s32 %s1575_s29, %s1645_s6 }
   0xe   : > { %p43_p0 = scmp.ne.s32.totalorder %s1571_s28, %s1567_s27  ;;  %p34_p1 = scmp.eq.s32.totalorder %s33_s8, 0 }
   0xf   : > { %p44_p2 = scmp.eq.s32.totalorder %s1575_s29, 0  ;;  %p1270_p4 = scmp.lt.s32.totalorder %s1575_s29, 4 }
  0x10   : > { %s1654_s9 = scalar_select %p34_p1, %s1571_s28, %s36_s30  }
  0x11   : > { %p45_p3 = por %p44_p2, %p43_p0  ;;  %s1661_s10 = sand.u32 1, %s1571_s28  }
  0x12   : > { %2169 = sst [smem:[#allocation19_spill]] %s1654_s9  ;;  %s277_s11 = sand.u32 1, %s1575_s29  }
  0x13   : > { %s1216_s12 = sshll.u32 %s1661_s10, 7  ;;  %p1665_p5 = pnand %p1270_p4, %p45_p3 }
  0x14   : > { %s1236_s14 = sshll.u32 %s1575_s29, 7  ;;  %s2171_s1 = sld [smem:[#allocation21_spill]] }
  0x15   : > { %s281_s19 = scalar_lea.vmem [#allocation6], %s1216_s12  ;;  %s1675_s21 = scalar_lea.sflag [#allocation7], %s277_s11 }
  0x16   : > { %s290_s20 = sshll.u32 %s281_s19, 4  ;;  %p1385_p7 = pneg %p1665_p5  ;;  %s291_s20 = int_to_ptr.vmem [resolvable:$true] %s290_s20 }
  0x1a   : > { %s287_s17 = scalar_lea.hbm %s2171_s1, %s1236_s14  ;;  %s1388_s30 = scalar_lea.hbm %s2171_s1, 512 }
  0x1b   : > { %s288_s18 = sshll.u32 %s287_s17, 4  ;;  %s289_s18 = int_to_ptr.hbm [resolvable:$true] %s288_s18 }
  0x1c   : > { %s1381_s22 = sshra.s32 %s289_s18, 4  ;;  %s1382_s22 = int_to_ptr.hbm [resolvable:$true] %s1381_s22 }
  0x1d   : > { %s1383_s23 = scalar_lea.hbm %s1382_s22, 128  ;;  %p1389_p10 = scmp.lt.s32.totalorder %s1382_s22, %s2171_s1 }
  0x1e   : > { %p1384_p6 = scmp.ne.s32.totalorder %s1382_s22, %s1383_s23  ;;  %p1390_p11 = scmp.lt.s32.totalorder %s1388_s30, %s1383_s23 }
  0x20   : > { %p1386_p8 = pnand %p1385_p7, %p1384_p6  ;;  %p1391_p12 = por %p1390_p11, %p1389_p10 }
  0x22   : > { %p1387_p9 = pneg %p1386_p8 }
  0x24   : > { %p1392_p13 = pnand %p1391_p12, %p1387_p9 }
  0x26   : > { %1395 = shalt.err (!%p1392_p13)
}
  0x27   : > { %s2154_s11 = smov 128   ;;  %s2156_s16 = smov 8  }
  0x28   : > { %1261 = dma.hbm_to_vmem [thread:$0]  (!%p1665_p5), %s289_s18, 2048, %s291_s20, %s1675_s21, %s2154_s11, %s2154_s11, %s2156_s16  }
  0x29   : > { %s310_s22 = scalar_lea.hbm %s2148_s2, %s1236_s14  ;;  %s304_s24 = scalar_lea.vmem [#allocation8], %s1216_s12 }
  0x2a   : > { %s311_s23 = sshll.u32 %s310_s22, 4  ;;  %s313_s25 = sshll.u32 %s304_s24, 4  ;;  %s1699_s23 = int_to_ptr.hbm [resolvable:$true] %s311_s23  ;;  %s1701_s25 = int_to_ptr.vmem [resolvable:$true] %s313_s25 }
  0x2b   : > { %s1704_s30 = sadd.s32 4294967295, %s1575_s29   ;;  %s1210_s8 = sadd.s32 4294967294, %s1575_s29  }
  0x2c   : > { %p49_p1 = scmp.ne.s32.totalorder %s1567_s27, %s1563_s26  ;;  %p2163_p2 = scmp.eq.s32.totalorder %s1704_s30, 0 }
  0x2d   : > { %p209_p3 = scmp.eq.s32.totalorder %s1704_s30, 3  ;;  %p215_p4 = scmp.eq.s32.totalorder %s1210_s8, 3 }
  0x2e   : > { %p1713_p6 = por %p2163_p2, %p49_p1  ;;  %p1211_p8 = scmp.ge.s32.totalorder %s1575_s29, 1 }
  0x2f   : > { %p1721_p9 = por %p209_p3, %p43_p0  ;;  %p1725_p10 = por %p215_p4, %p49_p1 }
  0x30   : > { %p222_p11 = scmp.lt.s32.totalorder %s1575_s29, 5  ;;  %s2176_s3 = sld [smem:[#allocation22_spill]] }
  0x31   : > { %s2174_s18 = scalar_select %p1725_p10, 1, 0 }
  0x32   : > { %p1733_p12 = pnand %p1211_p8, %p222_p11  ;;  %s1579_s22 = smov [#allocation9]  }
  0x33   : > { %2175 = sst [smem:[#allocation20_spill]] %s2174_s18  ;;  %s235_s24 = sshll.u32 %s1579_s22, 4  ;;  %s236_s24 = int_to_ptr.vmem [resolvable:$true] %s235_s24 }
  0x34   : > { %p1251_p0 = pneg %p1733_p12  ;;  %s1214_s8 = sshll.u32 %s1661_s10, 3 }
  0x35   : > { %s1215_s11 = sshll.u32 %s1575_s29, 3  ;;  %s262_s1 = scalar_lea.vmem [#allocation3], %s1214_s8 }
  0x36   : > { %s233_s17 = sshll.u32 %s2176_s3, 4  ;;  %p1252_p13 = pnand %p1251_p0, %p2163_p2  ;;  %s234_s17 = int_to_ptr.hbm [resolvable:$true] %s233_s17 }
  0x37   : > { %s266_s15 = scalar_lea.hbm %s2146_s0, %s1215_s11  ;;  %s270_s3 = sshll.u32 %s262_s1, 4  ;;  %s271_s3 = int_to_ptr.vmem [resolvable:$true] %s270_s3 }
  0x38   : > { %s268_s9 = sshll.u32 %s266_s15, 4  ;;  %s2178_s28 = smov 8   ;;  %s269_s9 = int_to_ptr.hbm [resolvable:$true] %s268_s9 }
  0x39   : > { %s2179_s6 = smov 128   ;;  %s259_s22 = scalar_lea.sflag [#allocation4], %s1661_s10 }
  0x3a   : > { %1254 = dma.hbm_to_vmem [thread:$0]  (!%p1252_p13), %s234_s17, 512, %s236_s24, [#allocation10], %s2179_s6, %s2179_s6, %s2178_s28  }
  0x3b   : > { %s1441_s18 = sshra.s32 %s269_s9, 4  ;;  %s1448_s1 = scalar_lea.hbm %s2146_s0, 32  ;;  %s1442_s18 = int_to_ptr.hbm [resolvable:$true] %s1441_s18 }
  0x3c   : > { %s1443_s26 = scalar_lea.hbm %s1442_s18, 8  ;;  %p1449_p8 = scmp.lt.s32.totalorder %s1442_s18, %s2146_s0 }
  0x3d   : > { %p1444_p1 = scmp.ne.s32.totalorder %s1442_s18, %s1443_s26  ;;  %p1450_p11 = scmp.lt.s32.totalorder %s1448_s1, %s1443_s26 }
  0x3f   : > { %p1446_p3 = pnand %p1444_p1, %p1385_p7  ;;  %p1451_p0 = por %p1450_p11, %p1449_p8 }
  0x41   : > { %p1447_p4 = pneg %p1446_p3 }
  0x43   : > { %p1452_p13 = pnand %p1451_p0, %p1447_p4 }
  0x45   : > { %1455 = shalt.err (!%p1452_p13)
}
  0x46   : > { %1258 = dma.hbm_to_vmem [thread:$0]  (!%p1665_p5), %s269_s9, 128, %s271_s3, %s259_s22  }
  0x47   : > { %s1471_s10 = sshra.s32 %s1699_s23, 4  ;;  %s1478_s26 = scalar_lea.hbm %s2148_s2, 512  ;;  %s1472_s10 = int_to_ptr.hbm [resolvable:$true] %s1471_s10 }
  0x48   : > { %s1473_s17 = scalar_lea.hbm %s1472_s10, 128  ;;  %p1479_p4 = scmp.lt.s32.totalorder %s1472_s10, %s2148_s2 }
  0x49   : > { %p1474_p1 = scmp.ne.s32.totalorder %s1472_s10, %s1473_s17  ;;  %p1480_p8 = scmp.lt.s32.totalorder %s1478_s26, %s1473_s17 }
  0x4b   : > { %p1476_p3 = pnand %p1474_p1, %p1385_p7  ;;  %p1481_p11 = por %p1480_p8, %p1479_p4 }
  0x4d   : > { %p1477_p2 = pneg %p1476_p3 }
  0x4f   : > { %p1482_p0 = pnand %p1481_p11, %p1477_p2 }
  0x51   : > { %1485 = shalt.err (!%p1482_p0)
}
  0x52   : > { %1264 = dma.hbm_to_vmem [thread:$0]  (!%p1665_p5), %s1699_s23, 2048, %s1701_s25, %s1675_s21, %s2179_s6, %s2179_s6, %s2178_s28  }
  0x53   : > { %325 = sbr.rel (%p1733_p12) target bundleno = 1039 (0x40f), region = 48  ;;  %s1782_s3 = sand.u32 (!%p1733_p12), 1, %s1567_s27  }
  0x54   : > { %s1225_s9 = sshll.u32 (!%p1733_p12), %s1782_s3, 3  ;;  %s328_s22 = scalar_lea.sflag (!%p1733_p12), [#allocation4], %s1782_s3 }
  0x55   : > { %s331_s13 = scalar_lea.vmem (!%p1733_p12), [#allocation3], %s1225_s9 }
  0x58   : > { %1546 = dma.done.wait (%p1713_p6), %s328_s22, 128  }
  0x59   : > { %1548 = vsyncadd (%p1713_p6), %s328_s22, 4294967168  ;;  %s337_s28 = sand.u32 1, %s1704_s30   ;;  %s1226_s6 = sshll.u32 %s1782_s3, 7 }
  0x5a   : > { %s338_s21 = scalar_lea.sflag [#allocation7], %s337_s28  ;;  %s1794_s23 = scalar_lea.vmem [#allocation6], %s1226_s6 }
  0x5b   : > { %1550 = dma.done.wait (%p1713_p6), %s338_s21, 4096  }
  0x5c   : > { %1552 = vsyncadd (%p1713_p6), %s338_s21, 4294963200  ;;  %s1800_s25 = scalar_lea.vmem [#allocation8], %s1226_s6  ;;  %p2180_p5 = scmp.eq.s32.totalorder %s1704_s30, 0 }
  0x5e   : > { %1554 = dma.done.wait (%p2180_p5), [#allocation10], 512   ;;  %p2181_p7 = pmov %p2180_p5 }
  0x5f   : > { %v404_v1 = vld [vmem:[#allocation9 + $0x18] sm:$0xff]  ;;  %v403_v2 = vld [vmem:[#allocation9 + $0x10] sm:$0xff]  ;;  %v402_v3 = vld [vmem:[#allocation9 + $0x8] sm:$0xff]  ;;  %vm409_vm0 = vcmask 261120   ;;  %v1580_v30 = vmov 0   ;;  %vm617_vm1 = vcmask 130112  }
  0x60   : > { %1556 = vsyncadd (%p2181_p7), [#allocation10], 4294966784  ;;  %425 = vmatpush.msra.mxu0 %v404_v1  ;;  %v401_v4 = vld [vmem:[#allocation9] sm:$0xff]  ;;  %v400_v5 = vld [vmem:[%s331_s13] sm:$0xff]  ;;  %1309 = vset.pattern.permute.xlu0 %v1580_v30  ;;  %vm640_vm2 = vcmask 1041409   ;;  %vm642_vm3 = vcmask 1042434  }
  0x61   : > { %v1312_v6 = vld [vmem:[%s2150_s4] ss:$0 sm:$0xff]  ;;  %v433_v9 = vld [vmem:[%s1800_s25] sm:$0xff]  ;;  %v435_v14 = vld [vmem:[%s1800_s25 + $0x10] sm:$0xff]  ;;  %1311 = vset.pattern.permute.xlu2 %v1580_v30  ;;  %1310 = vset.pattern.permute.xlu1 %v1580_v30  ;;  %vm644_vm4 = vcmask 1043459   ;;  %vm646_vm5 = vcmask 1044484  }
  0x62   : > { %426 = vmatpush.msra.mxu0 %v403_v2  ;;  %v437_v13 = vld [vmem:[%s1800_s25 + $0x20] sm:$0xff]  ;;  %v434_v15 = vld [vmem:[%s1800_s25 + $0x8] sm:$0xff]  ;;  %v436_v23 = vld [vmem:[%s1800_s25 + $0x18] sm:$0xff]  ;;  %vm648_vm6 = vcmask 1045509   ;;  %vm650_vm7 = vcmask 1046534   ;;  %vm652_vm8 = vcmask 1047559  }
  0x63   : > { %v438_v19 = vld [vmem:[%s1800_s25 + $0x28] sm:$0xff]  ;;  %v440_v32 = vld [vmem:[%s1800_s25 + $0x38] sm:$0xff]  ;;  %v439_v34 = vld [vmem:[%s1800_s25 + $0x30] sm:$0xff]  ;;  %vm655_vm9 = vcmask 130048   ;;  %s1232_s8 = sshll.u32 %s1704_s30, 3  ;;  %s397_s30 = scalar_lea.vmem [#allocation11], %s1225_s9 }
  0x64   : > { %427 = vmatpush.msra.mxu0 %v402_v3  ;;  %v1825_v26 = vld [vmem:[%s2151_s5] ss:$0 sm:$0xff]  ;;  %v441_v52 = vld [vmem:[%s1800_s25 + $0x40] sm:$0xff]  ;;  %v444_v63 = vld [vmem:[%s1800_s25 + $0x58] sm:$0xff]  ;;  %s1082_s17 = scalar_lea.hbm %s2153_s7, %s1232_s8  ;;  %s1084_s24 = sshll.u32 %s397_s30, 4  ;;  %s1085_s24 = int_to_ptr.vmem [resolvable:$true] %s1084_s24 }
  0x65   : > { %v442_v50 = vld [vmem:[%s1800_s25 + $0x48] sm:$0xff]  ;;  %v443_v1 = vld [vmem:[%s1800_s25 + $0x50] sm:$0xff]  ;;  %s1086_s15 = sshll.u32 %s1082_s17, 4  ;;  %s1072_s26 = scalar_lea.sflag [#allocation5], %s1782_s3  ;;  %s1087_s15 = int_to_ptr.hbm [resolvable:$true] %s1086_s15 }
  0x66   : > { %428 = vmatpush.msra.mxu0 %v401_v4  ;;  %s1515_s18 = sshra.s32 %s1087_s15, 4  ;;  %s1521_s13 = scalar_lea.hbm %s2153_s7, 32  ;;  %s1516_s18 = int_to_ptr.hbm [resolvable:$true] %s1515_s18 }
  0x67   : > { %1230 = vmatmul.msk.f32.vlgmr.msra.gmra.mxu0 %vm409_vm0, %v400_v5  ;;  %s1517_s16 = scalar_lea.hbm %s1516_s18, 8  ;;  %p1522_p13 = scmp.lt.s32.totalorder %s1516_s18, %s2153_s7 }
  0x68   : > { %p1518_p2 = scmp.ne.s32.totalorder %s1516_s18, %s1517_s16  ;;  %p1523_p1 = scmp.lt.s32.totalorder %s1521_s13, %s1517_s16 }
  0x6a   : > { %p1519_p6 = pnand %p1518_p2, %p1721_p9  ;;  %p1524_p3 = por %p1523_p1, %p1522_p13 }
  0x6c   : > { %p1520_p12 = pneg %p1519_p6 }
  0x6e   : > { %p1525_p4 = pnand %p1524_p3, %p1520_p12 }
  0xe4   : > { %v430_v7 = vpop.f32.mrf.mxu0 }
  0xe5   : > { %v1810_v8 = vadd.f32 %v1312_v6, %v430_v7 }
  0xe7   : > { %v457_v10 = vperm.slane %v1810_v8, 0  ;;  %v451_v11 = vrot.slane %v1810_v8, 2  ;;  %v450_v12 = vrot.slane %v1810_v8, 1  ;;  %v452_v25 = vrot.slane %v1810_v8, 3 }
  0xe8   : > { %v453_v41 = vrot.slane %v1810_v8, 4  ;;  %v454_v55 = vrot.slane %v1810_v8, 5  ;;  %v455_v3 = vrot.slane %v1810_v8, 6 }
  0xe9   : > { %v473_v16 = vadd.f32 %v457_v10, %v433_v9  ;;  %v459_v17 = vperm.slane %v451_v11, 0  ;;  %v458_v18 = vperm.slane %v450_v12, 0  ;;  %v474_v22 = vadd.f32 %v457_v10, %v434_v15  ;;  %v446_v12 = vld [vmem:[%s1800_s25 + $0x68] sm:$0xff] }
  0xea   : > { %v460_v29 = vperm.slane %v452_v25, 0  ;;  %v461_v48 = vperm.slane %v453_v41, 0  ;;  %v462_v61 = vperm.slane %v454_v55, 0  ;;  %v463_v10 = vperm.slane %v455_v3, 0  ;;  %v1314_v15 = vld [vmem:[#allocation2] ss:$0 sm:$0xff] }
  0xeb   : > { %1315 = vtanh.f32 %v473_v16  ;;  %v477_v20 = vadd.f32 %v459_v17, %v437_v13  ;;  %v475_v21 = vadd.f32 %v458_v18, %v435_v14  ;;  %v478_v24 = vadd.f32 %v459_v17, %v438_v19  ;;  %v445_v14 = vld [vmem:[%s1800_s25 + $0x60] sm:$0xff]  ;;  %v448_v25 = vld [vmem:[%s1800_s25 + $0x78] sm:$0xff] }
  0xec   : > { %v476_v27 = vadd.f32 %v458_v18, %v436_v23  ;;  %v480_v40 = vadd.f32 %v460_v29, %v440_v32  ;;  %v479_v43 = vadd.f32 %v460_v29, %v439_v34  ;;  %v482_v54 = vadd.f32 %v461_v48, %v442_v50 }
  0xed   : > { %1317 = vtanh.f32 %v477_v20  ;;  %v481_v57 = vadd.f32 %v461_v48, %v441_v52  ;;  %v484_v2 = vadd.f32 %v462_v61, %v444_v63  ;;  %v483_v5 = vadd.f32 %v462_v61, %v443_v1 }
  0xee   : > { %1319 = vtanh.f32 %v475_v21  ;;  %v486_v16 = vadd.f32 %v463_v10, %v446_v12  ;;  %v456_v17 = vrot.slane %v1810_v8, 7  ;;  %v485_v19 = vadd.f32 %v463_v10, %v445_v14 }
  0xef   : > { %1321 = vtanh.f32 %v474_v22  ;;  %v612_v52 = vlaneseq }
  0xf0   : > { %1323 = vtanh.f32 %v478_v24  ;;  %v464_v23 = vperm.slane %v456_v17, 0 }
  0xf1   : > { %v1316_v28 = vpop.eup %1315  ;;  %1325 = vtanh.f32 %v476_v27  ;;  %v1873_v55 = vand.u32 127, %v612_v52 }
  0xf2   : > { %v509_v31 = vmul.f32 %v1316_v28, %v1825_v26  ;;  %1327 = vtanh.f32 %v480_v40  ;;  %v447_v28 = vld [vmem:[%s1800_s25 + $0x70] sm:$0xff]  ;;  %v488_v8 = vadd.f32 %v464_v23, %v448_v25 }
  0xf3   : > { %v1318_v33 = vpop.eup %1317  ;;  %1329 = vtanh.f32 %v479_v43  ;;  %v487_v30 = vadd.f32 %v464_v23, %v447_v28 }
  0xf4   : > { %v1320_v35 = vpop.eup %1319  ;;  %v525_v36 = vsel %vm409_vm0, %v509_v31, 0.0  ;;  %v513_v37 = vmul.f32 %v1318_v33, %v1825_v26  ;;  %1331 = vtanh.f32 %v482_v54 }
  0xf5   : > { %v1322_v38 = vpop.eup %1321  ;;  %526 = vadd.xlane.f32.xlu0 %v525_v36  ;;  %v511_v39 = vmul.f32 %v1320_v35, %v1825_v26  ;;  %1333 = vtanh.f32 %v481_v57 }
  0xf6   : > { %v537_v42 = vsel %vm409_vm0, %v513_v37, 0.0  ;;  %v1324_v44 = vpop.eup %1323  ;;  %v510_v47 = vmul.f32 %v1322_v38, %v1825_v26  ;;  %1335 = vtanh.f32 %v484_v2 }
  0xf7   : > { %538 = vadd.xlane.f32.xlu2 %v537_v42  ;;  %v531_v45 = vsel %vm409_vm0, %v511_v39, 0.0  ;;  %v1326_v46 = vpop.eup %1325  ;;  %v514_v49 = vmul.f32 %v1324_v44, %v1825_v26  ;;  %1337 = vtanh.f32 %v483_v5 }
  0xf8   : > { %532 = vadd.xlane.f32.xlu1 %v531_v45  ;;  %v512_v51 = vmul.f32 %v1326_v46, %v1825_v26  ;;  %v528_v53 = vsel %vm409_vm0, %v510_v47, 0.0  ;;  %v1328_v58 = vpop.eup %1327  ;;  %1339 = vtanh.f32 %v486_v16 }
  0xf9   : > { %v540_v56 = vsel %vm409_vm0, %v514_v49, 0.0  ;;  %v1330_v60 = vpop.eup %1329  ;;  %v516_v62 = vmul.f32 %v1328_v58, %v1825_v26  ;;  %1341 = vtanh.f32 %v485_v19 }
  0xfa   : > { %v534_v59 = vsel %vm409_vm0, %v512_v51, 0.0  ;;  %v515_v0 = vmul.f32 %v1330_v60, %v1825_v26  ;;  %v1332_v6 = vpop.eup %1331  ;;  %1343 = vtanh.f32 %v488_v8 }
  0xfb   : > { %v546_v4 = vsel %vm409_vm0, %v516_v62, 0.0  ;;  %v1334_v9 = vpop.eup %1333  ;;  %v518_v11 = vmul.f32 %v1332_v6, %v1825_v26  ;;  %1345 = vtanh.f32 %v487_v30 }
  0xfc   : > { %v543_v7 = vsel %vm409_vm0, %v515_v0, 0.0  ;;  %v517_v13 = vmul.f32 %v1334_v9, %v1825_v26  ;;  %v1336_v20 = vpop.eup %1335 }
  0xfd   : > { %529 = vadd.xlane.f32.xlu0 %v528_v53  ;;  %v552_v18 = vsel %vm409_vm0, %v518_v11, 0.0  ;;  %v1338_v22 = vpop.eup %1337  ;;  %v520_v24 = vmul.f32 %v1336_v20, %v1825_v26 }
  0xfe   : > { %v549_v21 = vsel %vm409_vm0, %v517_v13, 0.0  ;;  %v519_v27 = vmul.f32 %v1338_v22, %v1825_v26  ;;  %v1340_v31 = vpop.eup %1339 }
  0xff   : > { %541 = vadd.xlane.f32.xlu2 %v540_v56  ;;  %v558_v29 = vsel %vm409_vm0, %v520_v24, 0.0  ;;  %v1342_v33 = vpop.eup %1341  ;;  %v522_v34 = vmul.f32 %v1340_v31, %v1825_v26  ;;  %v1876_v56 = vadd.s32 4294967288, %v1873_v55 }
 0x100   : > { %535 = vadd.xlane.f32.xlu1 %v534_v59  ;;  %v555_v32 = vsel %vm409_vm0, %v519_v27, 0.0  ;;  %v521_v35 = vmul.f32 %v1342_v33, %v1825_v26  ;;  %v1344_v37 = vpop.eup %1343 }
 0x101   : > { %v564_v36 = vsel %vm409_vm0, %v522_v34, 0.0  ;;  %v1346_v39 = vpop.eup %1345  ;;  %v524_v40 = vmul.f32 %v1344_v37, %v1825_v26 }
 0x102   : > { %v561_v38 = vsel %vm409_vm0, %v521_v35, 0.0  ;;  %v523_v41 = vmul.f32 %v1346_v39, %v1825_v26 }
 0x103   : > { %v570_v42 = vsel %vm409_vm0, %v524_v40, 0.0 }
 0x104   : > { %v567_v43 = vsel %vm409_vm0, %v523_v41, 0.0 }
 0x107   : > { %547 = vadd.xlane.f32.xlu2 %v546_v4 }
 0x108   : > { %544 = vadd.xlane.f32.xlu1 %v543_v7 }
 0x10f   : > { %553 = vadd.xlane.f32.xlu2 %v552_v18 }
 0x110   : > { %550 = vadd.xlane.f32.xlu1 %v549_v21 }
 0x111   : > { %577 = vperm.xlu0 %1309, %v1314_v15  }
 0x117   : > { %559 = vadd.xlane.f32.xlu2 %v558_v29 }
 0x118   : > { %556 = vadd.xlane.f32.xlu1 %v555_v32 }
 0x11f   : > { %565 = vadd.xlane.f32.xlu2 %v564_v36 }
 0x120   : > { %562 = vadd.xlane.f32.xlu1 %v561_v38 }
 0x127   : > { %571 = vadd.xlane.f32.xlu2 %v570_v42 }
 0x128   : > { %568 = vadd.xlane.f32.xlu1 %v567_v43 }
 0x168   : > { %v527_v48 = vpop.xlane.xlu0 %526 }
 0x16a   : > { %v539_v44 = vpop.xlane.xlu2 %538 }
 0x16b   : > { %v533_v45 = vpop.xlane.xlu1 %532 }
 0x170   : > { %v530_v51 = vpop.xlane.xlu0 %529 }
 0x172   : > { %v542_v46 = vpop.xlane.xlu2 %541 }
 0x173   : > { %v536_v47 = vpop.xlane.xlu1 %535 }
 0x17a   : > { %v548_v49 = vpop.xlane.xlu2 %547 }
 0x17b   : > { %v545_v50 = vpop.xlane.xlu1 %544 }
 0x182   : > { %v554_v53 = vpop.xlane.xlu2 %553 }
 0x183   : > { %v551_v54 = vpop.xlane.xlu1 %550  ;;  %v578_v26 = vpop.permute.xlu0 %577 }
 0x184   : > { %v1878_v58 = vadd.f32 %v578_v26, %v527_v48  ;;  %v1880_v59 = vadd.f32 %v578_v26, %v530_v51  ;;  %v1882_v60 = vadd.f32 %v578_v26, %v533_v45  ;;  %v1884_v61 = vadd.f32 %v578_v26, %v536_v47 }
 0x185   : > { %v1886_v63 = vadd.f32 %v578_v26, %v539_v44  ;;  %v1888_v0 = vadd.f32 %v578_v26, %v542_v46  ;;  %v1902_v9 = vadd.f32 %v578_v26, %v545_v50  ;;  %v1904_v10 = vadd.f32 %v578_v26, %v548_v49 }
 0x186   : > { %v614_v1 = vperm.slane %v1878_v58, %v1873_v55  ;;  %v616_v2 = vperm.slane %v1880_v59, %v1876_v56  ;;  %v619_v3 = vperm.slane %v1882_v60, %v1873_v55  ;;  %v620_v4 = vperm.slane %v1884_v61, %v1876_v56 }
 0x187   : > { %v622_v5 = vperm.slane %v1886_v63, %v1873_v55  ;;  %v623_v6 = vperm.slane %v1888_v0, %v1876_v56  ;;  %v588_v16 = vadd.f32 %v578_v26, %v551_v54  ;;  %v1912_v17 = vadd.f32 %v578_v26, %v554_v53 }
 0x188   : > { %v618_v11 = vsel %vm617_vm1, %v616_v2, %v614_v1  ;;  %v621_v12 = vsel %vm617_vm1, %v620_v4, %v619_v3  ;;  %v625_v22 = vperm.slane %v1902_v9, %v1873_v55  ;;  %v626_v23 = vperm.slane %v1904_v10, %v1876_v56 }
 0x189   : > { %v624_v20 = vsel %vm617_vm1, %v623_v6, %v622_v5  ;;  %v641_v21 = vsel %vm640_vm2, %v621_v12, %v618_v11  ;;  %v628_v29 = vperm.slane %v588_v16, %v1873_v55  ;;  %v629_v30 = vperm.slane %v1912_v17, %v1876_v56 }
 0x18a   : > { %v560_v57 = vpop.xlane.xlu2 %559  ;;  %v643_v27 = vsel %vm642_vm3, %v624_v20, %v641_v21  ;;  %v627_v32 = vsel %vm617_vm1, %v626_v23, %v625_v22 }
 0x18b   : > { %v557_v62 = vpop.xlane.xlu1 %556  ;;  %v1908_v14 = vadd.f32 %v578_v26, %v560_v57  ;;  %v645_v35 = vsel %vm644_vm4, %v627_v32, %v643_v27  ;;  %v630_v39 = vsel %vm617_vm1, %v629_v30, %v628_v29 }
 0x18c   : > { %v1910_v15 = vadd.f32 %v578_v26, %v557_v62  ;;  %v647_v42 = vsel %vm646_vm5, %v630_v39, %v645_v35 }
 0x18d   : > { %v632_v24 = vperm.slane %v1908_v14, %v1876_v56 }
 0x18e   : > { %v631_v25 = vperm.slane %v1910_v15, %v1873_v55 }
 0x190   : > { %v633_v36 = vsel %vm617_vm1, %v632_v24, %v631_v25 }
 0x191   : > { %v649_v43 = vsel %vm648_vm6, %v633_v36, %v647_v42 }
 0x192   : > { %v566_v7 = vpop.xlane.xlu2 %565 }
 0x193   : > { %v563_v13 = vpop.xlane.xlu1 %562  ;;  %v593_v18 = vadd.f32 %v578_v26, %v566_v7 }
 0x194   : > { %v1914_v19 = vadd.f32 %v578_v26, %v563_v13 }
 0x195   : > { %v635_v28 = vperm.slane %v593_v18, %v1876_v56 }
 0x196   : > { %v634_v8 = vperm.slane %v1914_v19, %v1873_v55 }
 0x198   : > { %v636_v40 = vsel %vm617_vm1, %v635_v28, %v634_v8 }
 0x199   : > { %v651_v45 = vsel %vm650_vm7, %v636_v40, %v649_v43 }
 0x19a   : > { %v572_v31 = vpop.xlane.xlu2 %571 }
 0x19b   : > { %v1934_v33 = vadd.f32 %v578_v26, %v572_v31  ;;  %v569_v34 = vpop.xlane.xlu1 %568 }
 0x19c   : > { %v1938_v37 = vadd.f32 %v578_v26, %v569_v34 }
 0x19d   : > { %v638_v38 = vperm.slane %v1934_v33, %v1876_v56 }
 0x19e   : > { %v637_v41 = vperm.slane %v1938_v37, %v1873_v55 }
 0x1a0   : > { %v639_v44 = vsel %vm617_vm1, %v638_v38, %v637_v41 }
 0x1a1   : > { %v653_v46 = vsel %vm652_vm8, %v639_v44, %v651_v45 }
 0x1a2   : > { %v656_v47 = vsel %vm655_vm9, %v653_v46, -inf }
 0x1a3   : > { %657 = vmax.xlane.f32.xlu0 %v656_v47 }
 0x216   : > { %v1952_v48 = vpop.xlane.xlu0 %657 }
 0x217   : > { %v664_v49 = vperm.slane %v1952_v48, 4  ;;  %v660_v50 = vperm.slane %v1952_v48, 0  ;;  %v666_v54 = vperm.slane %v1952_v48, 6  ;;  %v661_v26 = vperm.slane %v1952_v48, 1 }
 0x218   : > { %v665_v25 = vperm.slane %v1952_v48, 5  ;;  %v667_v35 = vperm.slane %v1952_v48, 7 }
 0x219   : > { %v684_v51 = vsub.f32 %v588_v16, %v664_v49  ;;  %v677_v52 = vsub.f32 %v1880_v59, %v660_v50  ;;  %v676_v53 = vsub.f32 %v1878_v58, %v660_v50  ;;  %v689_v2 = vsub.f32 %v593_v18, %v666_v54 }
 0x21a   : > { %v678_v3 = vsub.f32 %v1882_v60, %v661_v26  ;;  %v679_v4 = vsub.f32 %v1884_v61, %v661_v26  ;;  %v662_v59 = vperm.slane %v1952_v48, 2  ;;  %v663_v16 = vperm.slane %v1952_v48, 3 }
 0x21b   : > { %v708_v57 = vmul.f32 1.442695, %v684_v51  ;;  %v694_v62 = vmul.f32 1.442695, %v677_v52  ;;  %v692_v1 = vmul.f32 1.442695, %v676_v53  ;;  %v685_v8 = vsub.f32 %v1912_v17, %v664_v49 }
 0x21c   : > { %v718_v5 = vmul.f32 1.442695, %v689_v2  ;;  %v696_v6 = vmul.f32 1.442695, %v678_v3  ;;  %v698_v7 = vmul.f32 1.442695, %v679_v4  ;;  %v680_v60 = vsub.f32 %v1886_v63, %v662_v59 }
 0x21d   : > { %1347 = vpow2.f32 %v708_v57  ;;  %v681_v61 = vsub.f32 %v1888_v0, %v662_v59  ;;  %v682_v63 = vsub.f32 %v1902_v9, %v663_v16  ;;  %v683_v0 = vsub.f32 %v1904_v10, %v663_v16 }
 0x21e   : > { %1349 = vpow2.f32 %v694_v62  ;;  %v700_v13 = vmul.f32 1.442695, %v680_v60  ;;  %v686_v9 = vsub.f32 %v1910_v15, %v665_v25  ;;  %v710_v29 = vmul.f32 1.442695, %v685_v8 }
 0x21f   : > { %1351 = vpow2.f32 %v692_v1  ;;  %v702_v20 = vmul.f32 1.442695, %v681_v61  ;;  %v704_v23 = vmul.f32 1.442695, %v682_v63  ;;  %v706_v24 = vmul.f32 1.442695, %v683_v0 }
 0x220   : > { %1353 = vpow2.f32 %v718_v5  ;;  %v712_v10 = vmul.f32 1.442695, %v686_v9  ;;  %v687_v32 = vsub.f32 %v1908_v14, %v665_v25  ;;  %v688_v34 = vsub.f32 %v1914_v19, %v666_v54 }
 0x221   : > { %1355 = vpow2.f32 %v696_v6  ;;  %v690_v39 = vsub.f32 %v1938_v37, %v667_v35  ;;  %v691_v14 = vsub.f32 %v1934_v33, %v667_v35 }
 0x222   : > { %1357 = vpow2.f32 %v698_v7  ;;  %v714_v17 = vmul.f32 1.442695, %v687_v32  ;;  %v716_v15 = vmul.f32 1.442695, %v688_v34 }
 0x223   : > { %v1963_v58 = vpop.eup %1347  ;;  %1359 = vpow2.f32 %v700_v13  ;;  %v720_v40 = vmul.f32 1.442695, %v690_v39  ;;  %v722_v19 = vmul.f32 1.442695, %v691_v14 }
 0x224   : > { %v1965_v11 = vpop.eup %1349  ;;  %765 = vperm.xlu0 %1309, %v1963_v58   ;;  %1361 = vpow2.f32 %v702_v20 }
 0x225   : > { %v1968_v12 = vpop.eup %1351  ;;  %744 = vperm.xlu2 %1311, %v1965_v11   ;;  %1363 = vpow2.f32 %v704_v23 }
 0x226   : > { %741 = vperm.xlu1 %1310, %v1968_v12   ;;  %v1975_v18 = vpop.eup %1353  ;;  %1365 = vpow2.f32 %v706_v24 }
 0x227   : > { %v1977_v21 = vpop.eup %1355  ;;  %1367 = vpow2.f32 %v710_v29 }
 0x228   : > { %v1980_v22 = vpop.eup %1357  ;;  %1369 = vpow2.f32 %v712_v10 }
 0x229   : > { %v1987_v27 = vpop.eup %1359  ;;  %1371 = vpow2.f32 %v714_v17 }
 0x22a   : > { %v1989_v28 = vpop.eup %1361  ;;  %1373 = vpow2.f32 %v716_v15 }
 0x22b   : > { %v1995_v30 = vpop.eup %1363  ;;  %1375 = vpow2.f32 %v720_v40 }
 0x22c   : > { %780 = vperm.xlu0 %1309, %v1975_v18   ;;  %v1997_v31 = vpop.eup %1365  ;;  %1377 = vpow2.f32 %v722_v19 }
 0x22d   : > { %747 = vperm.xlu2 %1311, %v1977_v21   ;;  %v2004_v36 = vpop.eup %1367 }
 0x22e   : > { %750 = vperm.xlu1 %1310, %v1980_v22   ;;  %v2006_v38 = vpop.eup %1369 }
 0x22f   : > { %v2012_v41 = vpop.eup %1371 }
 0x230   : > { %v2014_v42 = vpop.eup %1373 }
 0x231   : > { %v2018_v43 = vpop.eup %1375 }
 0x232   : > { %v2020_v44 = vpop.eup %1377 }
 0x235   : > { %753 = vperm.xlu2 %1311, %v1987_v27  }
 0x236   : > { %756 = vperm.xlu1 %1310, %v1989_v28  }
 0x23d   : > { %759 = vperm.xlu2 %1311, %v1995_v30  }
 0x23e   : > { %762 = vperm.xlu1 %1310, %v1997_v31  }
 0x245   : > { %768 = vperm.xlu2 %1311, %v2004_v36  }
 0x246   : > { %771 = vperm.xlu1 %1310, %v2006_v38  }
 0x24d   : > { %774 = vperm.xlu2 %1311, %v2012_v41  }
 0x24e   : > { %777 = vperm.xlu1 %1310, %v2014_v42  }
 0x255   : > { %783 = vperm.xlu2 %1311, %v2018_v43  }
 0x256   : > { %786 = vperm.xlu1 %1310, %v2020_v44  }
 0x27f   : > { %v745_v33 = vpop.permute.xlu2 %744 }
 0x280   : > { %v789_v5 = vperm.slane %v745_v33, %v1876_v56 }
 0x287   : > { %v748_v37 = vpop.permute.xlu2 %747 }
 0x288   : > { %v791_v62 = vperm.slane %v748_v37, %v1873_v55 }
 0x28f   : > { %v754_v46 = vpop.permute.xlu2 %753 }
 0x290   : > { %v794_v3 = vperm.slane %v754_v46, %v1873_v55 }
 0x296   : > { %v766_v53 = vpop.permute.xlu0 %765 }
 0x297   : > { %v760_v48 = vpop.permute.xlu2 %759  ;;  %v800_v25 = vperm.slane %v766_v53, %v1873_v55 }
 0x298   : > { %v742_v45 = vpop.permute.xlu1 %741  ;;  %v797_v6 = vperm.slane %v760_v48, %v1873_v55 }
 0x299   : > { %v788_v1 = vperm.slane %v742_v45, %v1873_v55 }
 0x29b   : > { %v790_v60 = vsel %vm617_vm1, %v789_v5, %v788_v1 }
 0x29e   : > { %v781_v61 = vpop.permute.xlu0 %780 }
 0x29f   : > { %v769_v51 = vpop.permute.xlu2 %768  ;;  %v807_v8 = vperm.slane %v781_v61, %v1876_v56 }
 0x2a0   : > { %v751_v47 = vpop.permute.xlu1 %750  ;;  %v801_v20 = vperm.slane %v769_v51, %v1876_v56 }
 0x2a1   : > { %v792_v26 = vperm.slane %v751_v47, %v1876_v56 }
 0x2a2   : > { %v802_v32 = vsel %vm617_vm1, %v801_v20, %v800_v25  ;;  %v877_v25 = vld [vmem:[%s1794_s23 + $0x38] sm:$0xff] }
 0x2a3   : > { %v793_v59 = vsel %vm617_vm1, %v792_v26, %v791_v62 }
 0x2a4   : > { %v812_v63 = vsel %vm640_vm2, %v793_v59, %v790_v60 }
 0x2a7   : > { %v775_v54 = vpop.permute.xlu2 %774 }
 0x2a8   : > { %v757_v49 = vpop.permute.xlu1 %756  ;;  %v804_v23 = vperm.slane %v775_v54, %v1876_v56 }
 0x2a9   : > { %v795_v57 = vperm.slane %v757_v49, %v1876_v56 }
 0x2ab   : > { %v796_v7 = vsel %vm617_vm1, %v795_v57, %v794_v3 }
 0x2ac   : > { %v813_v24 = vsel %vm642_vm3, %v796_v7, %v812_v63 }
 0x2af   : > { %v784_v9 = vpop.permute.xlu2 %783 }
 0x2b0   : > { %v763_v50 = vpop.permute.xlu1 %762  ;;  %v809_v35 = vperm.slane %v784_v9, %v1873_v55 }
 0x2b1   : > { %v798_v2 = vperm.slane %v763_v50, %v1876_v56 }
 0x2b3   : > { %v799_v13 = vsel %vm617_vm1, %v798_v2, %v797_v6 }
 0x2b4   : > { %v814_v29 = vsel %vm644_vm4, %v799_v13, %v813_v24  ;;  %v871_v24 = vld [vmem:[%s1794_s23 + $0x8] sm:$0xff] }
 0x2b5   : > { %v815_v39 = vsel %vm646_vm5, %v802_v32, %v814_v29  ;;  %v876_v29 = vld [vmem:[%s1794_s23 + $0x30] sm:$0xff] }
 0x2b8   : > { %v772_v52 = vpop.permute.xlu1 %771 }
 0x2b9   : > { %v803_v16 = vperm.slane %v772_v52, %v1873_v55 }
 0x2bb   : > { %v805_v10 = vsel %vm617_vm1, %v804_v23, %v803_v16  ;;  %v872_v23 = vld [vmem:[%s1794_s23 + $0x10] sm:$0xff] }
 0x2bc   : > { %v816_v14 = vsel %vm648_vm6, %v805_v10, %v815_v39 }
 0x2c0   : > { %v778_v4 = vpop.permute.xlu1 %777 }
 0x2c1   : > { %v806_v0 = vperm.slane %v778_v4, %v1873_v55 }
 0x2c3   : > { %v808_v34 = vsel %vm617_vm1, %v807_v8, %v806_v0  ;;  %v873_v0 = vld [vmem:[%s1794_s23 + $0x18] sm:$0xff]  ;;  %v870_v8 = vld [vmem:[%s1794_s23] sm:$0xff] }
 0x2c4   : > { %v817_v19 = vsel %vm650_vm7, %v808_v34, %v816_v14 }
 0x2c8   : > { %v787_v17 = vpop.permute.xlu1 %786 }
 0x2c9   : > { %v810_v15 = vperm.slane %v787_v17, %v1876_v56 }
 0x2cb   : > { %v811_v40 = vsel %vm617_vm1, %v810_v15, %v809_v35 }
 0x2cc   : > { %v818_v33 = vsel %vm652_vm8, %v811_v40, %v817_v19 }
 0x2cd   : > { %v820_v37 = vsel %vm655_vm9, %v818_v33, 0.0  ;;  %v878_v33 = vld [vmem:[%s1794_s23 + $0x40] sm:$0xff] }
 0x2ce   : > { %821 = vadd.xlane.f32.xlu0 %v820_v37 }
 0x341   : > { %v822_v45 = vpop.xlane.xlu0 %821 }
 0x342   : > { %1379 = vrcp.f32 %v822_v45  ;;  %v834_v48 = vand.u32 2147483648, %v822_v45  ;;  %v832_v49 = vand.u32 2147483647, %v822_v45  ;;  %vm828_vm11 = vweird.f32 %v822_v45 }
 0x344   : > { %v835_v51 = vor.u32 1.1754944e-38, %v834_v48  ;;  %vm833_vm13 = vcmp.eq.f32.partialorder %v832_v49, 8.507059e+37  ;;  %v880_v49 = vld [vmem:[%s1794_s23 + $0x50] sm:$0xff] }
 0x348   : > { %v1380_v46 = vpop.eup %1379 }
 0x349   : > { %v824_v47 = vmul.f32 %v1380_v46, %v822_v45  ;;  %vm829_vm10 = vweird.f32 %v1380_v46  ;;  %v881_v45 = vld [vmem:[%s1794_s23 + $0x58] sm:$0xff] }
 0x34a   : > { %vm830_vm12 = vmor %vm828_vm11, %vm829_vm10 }
 0x34b   : > { %v825_v55 = vsub.f32 1.0, %v824_v47 }
 0x34d   : > { %v826_v56 = vmul.f32 %v1380_v46, %v825_v55 }
 0x34f   : > { %v827_v50 = vadd.f32 %v1380_v46, %v826_v56 }
 0x351   : > { %v831_v52 = vsel %vm830_vm12, %v1380_v46, %v827_v50 }
 0x352   : > { %v836_v53 = vsel %vm833_vm13, %v835_v51, %v831_v52  ;;  %v879_v52 = vld [vmem:[%s1794_s23 + $0x48] sm:$0xff] }
 0x353   : > { %v843_v54 = vperm.slane %v836_v53, 5  ;;  %v838_v26 = vperm.slane %v836_v53, 0  ;;  %v839_v2 = vperm.slane %v836_v53, 1  ;;  %v840_v5 = vperm.slane %v836_v53, 2 }
 0x354   : > { %v842_v7 = vperm.slane %v836_v53, 4  ;;  %v844_v60 = vperm.slane %v836_v53, 6 }
 0x355   : > { %v864_v57 = vmul.f32 %v2006_v38, %v843_v54  ;;  %v855_v62 = vmul.f32 %v1965_v11, %v838_v26  ;;  %v854_v1 = vmul.f32 %v1968_v12, %v838_v26  ;;  %v857_v3 = vmul.f32 %v1980_v22, %v839_v2 }
 0x356   : > { %v856_v4 = vmul.f32 %v1977_v21, %v839_v2  ;;  %v859_v6 = vmul.f32 %v1989_v28, %v840_v5  ;;  %v858_v59 = vmul.f32 %v1987_v27, %v840_v5  ;;  %v841_v11 = vperm.slane %v836_v53, 3 }
 0x357   : > { %938 = vperm.xlu0 %1309, %v864_v57   ;;  %893 = vperm.xlu1 %1310, %v855_v62   ;;  %v863_v22 = vmul.f32 %v2004_v36, %v842_v7  ;;  %v862_v21 = vmul.f32 %v1963_v58, %v842_v7  ;;  %v866_v28 = vmul.f32 %v2014_v42, %v844_v60 }
 0x358   : > { %888 = vperm.xlu2 %1311, %v854_v1   ;;  %v861_v12 = vmul.f32 %v1997_v31, %v841_v11  ;;  %v860_v38 = vmul.f32 %v1995_v30, %v841_v11  ;;  %v865_v27 = vmul.f32 %v2012_v41, %v843_v54  ;;  %v845_v31 = vperm.slane %v836_v53, 7 }
 0x359   : > { %v867_v61 = vmul.f32 %v1975_v18, %v844_v60  ;;  %v875_v18 = vld [vmem:[%s1794_s23 + $0x28] sm:$0xff] }
 0x35a   : > { %v868_v30 = vmul.f32 %v2018_v43, %v845_v31  ;;  %v869_v58 = vmul.f32 %v2020_v44, %v845_v31  ;;  %v874_v44 = vld [vmem:[%s1794_s23 + $0x20] sm:$0xff] }
 0x35f   : > { %903 = vperm.xlu1 %1310, %v857_v3  }
 0x360   : > { %898 = vperm.xlu2 %1311, %v856_v4  }
 0x367   : > { %913 = vperm.xlu1 %1310, %v859_v6  }
 0x368   : > { %908 = vperm.xlu2 %1311, %v858_v59  }
 0x36f   : > { %923 = vperm.xlu1 %1310, %v861_v12  }
 0x370   : > { %918 = vperm.xlu2 %1311, %v860_v38  }
 0x377   : > { %933 = vperm.xlu1 %1310, %v863_v22  }
 0x378   : > { %928 = vperm.xlu2 %1311, %v862_v21   ;;  %v883_v21 = vld [vmem:[%s1794_s23 + $0x68] sm:$0xff] }
 0x37f   : > { %948 = vperm.xlu1 %1310, %v866_v28  }
 0x380   : > { %943 = vperm.xlu2 %1311, %v865_v27  }
 0x387   : > { %958 = vperm.xlu1 %1310, %v868_v30  }
 0x388   : > { %953 = vperm.xlu2 %1311, %v867_v61   ;;  %v882_v61 = vld [vmem:[%s1794_s23 + $0x60] sm:$0xff] }
 0x390   : > { %963 = vperm.xlu2 %1311, %v869_v58  }
 0x3b2   : > { %v889_v36 = vpop.permute.xlu2 %888 }
 0x3b3   : > { %v966_v39 = vmul.f32 %v889_v36, %v870_v8  ;;  %v885_v8 = vld [vmem:[%s1794_s23 + $0x78] sm:$0xff] }
 0x3b5   : > { %v982_v48 = vsel %vm409_vm0, %v966_v39, 0.0 }
 0x3ba   : > { %v899_v41 = vpop.permute.xlu2 %898 }
 0x3bb   : > { %v968_v17 = vmul.f32 %v899_v41, %v872_v23 }
 0x3bd   : > { %v991_v46 = vsel %vm409_vm0, %v968_v17, 0.0  ;;  %v884_v17 = vld [vmem:[%s1794_s23 + $0x70] sm:$0xff] }
 0x3c2   : > { %v909_v42 = vpop.permute.xlu2 %908 }
 0x3c3   : > { %v970_v14 = vmul.f32 %v909_v42, %v874_v44 }
 0x3c5   : > { %v1000_v56 = vsel %vm409_vm0, %v970_v14, 0.0 }
 0x3c9   : > { %v894_v13 = vpop.permute.xlu1 %893  ;;  %v939_v50 = vpop.permute.xlu0 %938 }
 0x3ca   : > { %v919_v16 = vpop.permute.xlu2 %918  ;;  %v967_v35 = vmul.f32 %v894_v13, %v871_v24  ;;  %v976_v3 = vmul.f32 %v939_v50, %v880_v49 }
 0x3cb   : > { %v972_v40 = vmul.f32 %v919_v16, %v876_v29 }
 0x3cc   : > { %v983_v47 = vsel %vm409_vm0, %v967_v35, 0.0  ;;  %v1027_v28 = vsel %vm409_vm0, %v976_v3, 0.0 }
 0x3cd   : > { %v1009_v53 = vsel %vm409_vm0, %v972_v40, 0.0  ;;  %v984_v62 = vadd.f32 %v983_v47, %v982_v48 }
 0x3cf   : > { %v985_v7 = vrot.slane %v984_v62, 4 }
 0x3d1   : > { %v904_v20 = vpop.permute.xlu1 %903  ;;  %v986_v41 = vadd.f32 %v985_v7, %v984_v62 }
 0x3d2   : > { %v929_v43 = vpop.permute.xlu2 %928  ;;  %v969_v9 = vmul.f32 %v904_v20, %v873_v0 }
 0x3d3   : > { %v974_v54 = vmul.f32 %v929_v43, %v878_v33  ;;  %v987_v24 = vrot.slane %v986_v41, 2 }
 0x3d4   : > { %v992_v19 = vsel %vm409_vm0, %v969_v9, 0.0 }
 0x3d5   : > { %v993_v51 = vadd.f32 %v992_v19, %v991_v46  ;;  %v1018_v59 = vsel %vm409_vm0, %v974_v54, 0.0  ;;  %v988_v39 = vadd.f32 %v987_v24, %v986_v41 }
 0x3d7   : > { %v994_v5 = vrot.slane %v993_v51, 4  ;;  %v989_v49 = vrot.slane %v988_v39, 1 }
 0x3d9   : > { %v914_v63 = vpop.permute.xlu1 %913  ;;  %v995_v27 = vadd.f32 %v994_v5, %v993_v51 }
 0x3da   : > { %v971_v10 = vmul.f32 %v914_v63, %v875_v18  ;;  %v944_v32 = vpop.permute.xlu2 %943 }
 0x3db   : > { %v977_v57 = vmul.f32 %v944_v32, %v881_v45  ;;  %v996_v43 = vrot.slane %v995_v27, 2 }
 0x3dc   : > { %v1001_v37 = vsel %vm409_vm0, %v971_v10, 0.0 }
 0x3dd   : > { %v1002_v26 = vadd.f32 %v1001_v37, %v1000_v56  ;;  %v1028_v12 = vsel %vm409_vm0, %v977_v57, 0.0  ;;  %v997_v10 = vadd.f32 %v996_v43, %v995_v27 }
 0x3de   : > { %v1029_v31 = vadd.f32 %v1028_v12, %v1027_v28 }
 0x3df   : > { %v1003_v11 = vrot.slane %v1002_v26, 4  ;;  %v998_v45 = vrot.slane %v997_v10, 1 }
 0x3e0   : > { %v1030_v63 = vrot.slane %v1029_v31, 4 }
 0x3e1   : > { %v924_v34 = vpop.permute.xlu1 %923  ;;  %v1004_v58 = vadd.f32 %v1003_v11, %v1002_v26  ;;  %v999_v54 = vadd.f32 %v998_v45, %v997_v10 }
 0x3e2   : > { %v973_v15 = vmul.f32 %v924_v34, %v877_v25  ;;  %v954_v6 = vpop.permute.xlu2 %953  ;;  %v1031_v32 = vadd.f32 %v1030_v63, %v1029_v31 }
 0x3e3   : > { %v979_v36 = vmul.f32 %v954_v6, %v883_v21  ;;  %v1005_v0 = vrot.slane %v1004_v58, 2 }
 0x3e4   : > { %v1010_v55 = vsel %vm409_vm0, %v973_v15, 0.0  ;;  %v1032_v46 = vrot.slane %v1031_v32, 2 }
 0x3e5   : > { %v1011_v1 = vadd.f32 %v1010_v55, %v1009_v53  ;;  %v1037_v18 = vsel %vm409_vm0, %v979_v36, 0.0  ;;  %v1006_v35 = vadd.f32 %v1005_v0, %v1004_v58 }
 0x3e6   : > { %v1033_v26 = vadd.f32 %v1032_v46, %v1031_v32 }
 0x3e7   : > { %v1012_v22 = vrot.slane %v1011_v1, 4  ;;  %v1007_v55 = vrot.slane %v1006_v35, 1 }
 0x3e9   : > { %v934_v2 = vpop.permute.xlu1 %933  ;;  %v1013_v42 = vadd.f32 %v1012_v22, %v1011_v1  ;;  %v1008_v62 = vadd.f32 %v1007_v55, %v1006_v35  ;;  %v990_v1 = vadd.f32 %v989_v49, %v988_v39 }
 0x3ea   : > { %v975_v4 = vmul.f32 %v934_v2, %v879_v52  ;;  %v964_v44 = vpop.permute.xlu2 %963 }
 0x3eb   : > { %v1014_v25 = vrot.slane %v1013_v42, 2  ;;  %v981_v15 = vmul.f32 %v964_v44, %v885_v8  ;;  %v1062_v6 = vsel %vm640_vm2, %v999_v54, %v990_v1 }
 0x3ec   : > { %v1019_v38 = vsel %vm409_vm0, %v975_v4, 0.0  ;;  %v1063_v12 = vsel %vm642_vm3, %v1008_v62, %v1062_v6 }
 0x3ed   : > { %v1020_v60 = vadd.f32 %v1019_v38, %v1018_v59  ;;  %v1015_v14 = vadd.f32 %v1014_v25, %v1013_v42  ;;  %v1046_v48 = vsel %vm409_vm0, %v981_v15, 0.0  ;;  %v1034_v59 = vrot.slane %v1033_v26, 1 }
 0x3ef   : > { %v1021_v30 = vrot.slane %v1020_v60, 4  ;;  %v1016_v50 = vrot.slane %v1015_v14, 1 }
 0x3f1   : > { %v949_v13 = vpop.permute.xlu1 %948  ;;  %v1022_v16 = vadd.f32 %v1021_v30, %v1020_v60  ;;  %v1017_v2 = vadd.f32 %v1016_v50, %v1015_v14  ;;  %v1035_v60 = vadd.f32 %v1034_v59, %v1033_v26 }
 0x3f2   : > { %v978_v20 = vmul.f32 %v949_v13, %v882_v61 }
 0x3f3   : > { %v1023_v29 = vrot.slane %v1022_v16, 2  ;;  %v1064_v38 = vsel %vm644_vm4, %v1017_v2, %v1063_v12 }
 0x3f4   : > { %v1036_v23 = vsel %vm409_vm0, %v978_v20, 0.0 }
 0x3f5   : > { %v1038_v9 = vadd.f32 %v1037_v18, %v1036_v23  ;;  %v1024_v33 = vadd.f32 %v1023_v29, %v1022_v16 }
 0x3f7   : > { %v1039_v34 = vrot.slane %v1038_v9, 4  ;;  %v1025_v52 = vrot.slane %v1024_v33, 1 }
 0x3f9   : > { %v1040_v40 = vadd.f32 %v1039_v34, %v1038_v9  ;;  %v959_v19 = vpop.permute.xlu1 %958  ;;  %v1026_v4 = vadd.f32 %v1025_v52, %v1024_v33 }
 0x3fa   : > { %v980_v37 = vmul.f32 %v959_v19, %v884_v17 }
 0x3fb   : > { %v1041_v47 = vrot.slane %v1040_v40, 2  ;;  %v1065_v22 = vsel %vm646_vm5, %v1026_v4, %v1064_v38 }
 0x3fc   : > { %v1045_v56 = vsel %vm409_vm0, %v980_v37, 0.0  ;;  %v1066_v31 = vsel %vm648_vm6, %v1035_v60, %v1065_v22 }
 0x3fd   : > { %v1047_v51 = vadd.f32 %v1046_v48, %v1045_v56  ;;  %v1042_v53 = vadd.f32 %v1041_v47, %v1040_v40 }
 0x3ff   : > { %v1048_v57 = vrot.slane %v1047_v51, 4  ;;  %v1043_v5 = vrot.slane %v1042_v53, 1 }
 0x401   : > { %v1049_v3 = vadd.f32 %v1048_v57, %v1047_v51  ;;  %v1044_v21 = vadd.f32 %v1043_v5, %v1042_v53 }
 0x403   : > { %v1050_v11 = vrot.slane %v1049_v3, 2  ;;  %v1067_v30 = vsel %vm650_vm7, %v1044_v21, %v1066_v31 }
 0x405   : > { %v1051_v7 = vadd.f32 %v1050_v11, %v1049_v3 }
 0x407   : > { %v1052_v28 = vrot.slane %v1051_v7, 1 }
 0x409   : > { %v1053_v27 = vadd.f32 %v1052_v28, %v1051_v7 }
 0x40b   : > { %v1068_v61 = vsel %vm652_vm8, %v1053_v27, %v1067_v30 }
 0x40c   : > { %1070 = vst.msk [vmem:[%s397_s30] sm:$0xff] %vm409_vm0, %v1068_v61 }
 0x40d   : > { %1528 = shalt.err (!%p1525_p4)
}
 0x40e   : > { %1249 = dma.vmem_to_hbm [thread:$0]  (%p1721_p9), %s1085_s24, 128, %s1087_s15, %s1072_s26  }
 0x40f PF: > { %s2182_s3 = sld [smem:[#allocation16_spill]]  ;;  %p1272_p8 = scmp.ge.s32.totalorder %s1575_s29, 2 }
 0x411   : > { %p1266_p11 = pnand %p1272_p8, %p1725_p10 }
 0x413   : > { %p1267_p0 = pneg %p1266_p11 }
 0x415   : > { %s1098_s23 = sand.u32 1, %s2182_s3  }
 0x416   : > { %s1099_s25 = scalar_lea.sflag [#allocation5], %s1098_s23 }
 0x417   : > { %1558 = dma.done.wait (%p1267_p0), %s1099_s25, 128  }
 0x418   : > { %1560 = vsyncadd (%p1267_p0), %s1099_s25, 4294967168  ;;  %s2184_s29 = sld [smem:[#allocation18_spill]]  ;;  %s2187_s26 = smov %s1567_s27 }
 0x419   : > { %s2185_s12 = sld [smem:[#allocation17_spill]] }
 0x41a   : > { %s2186_s28 = sld [smem:[#allocation19_spill]] }
 0x41e   : > { %p26_p5 = scmp.ge.s32.totalorder %s2184_s29, 6  }
 0x41f   : > { %s2188_s27 = smov %s2185_s12 }
 0x420   :  { %28 = sbr.rel (!%p26_p5) target bundleno = 11 (0xb), region = 121 }
 0x425   :  { %1105 = vsyncpa [#allocation4], 1 }
 0x426   :  { %1107 = vsyncpa [#allocation4 + $0x1], 1 }
 0x427   :  { %1108 = vsyncpa [#allocation7], 1 }
 0x428   :  { %1110 = vsyncpa [#allocation7 + $0x1], 1 }
 0x429   :  { %1111 = vsyncpa [#allocation10], 1 }
 0x42a   :  { %1112 = vsyncpa [#allocation5], 1 }
 0x42b   :  { %1114 = vsyncpa [#allocation5 + $0x1], 1 }

</bundles_post_ra>
